<compile_context>
chip_gen: v7x
topology: tpu7x:2x2x1
jax: 0.10.0
libtpu: 0.0.40
codegen_flags: <defaults>
</compile_context>

<pallas_src>
import jax
import jax.numpy as jnp
from jax.experimental import pallas as pl
from jax.experimental.pallas import tpu as pltpu

NUM_CLASSES = 10
EMBED_DIM = 128
HIDDEN_DIM = 64
IMG_PIX = 28 * 28  # 784


def _round_up(n, m):
    return ((n + m - 1) // m) * m


def _ws_kernel(x_ref, wbig_ref, b1_ref, w2big_ref, b2_ref, w20_ref, out_ref):
    """One batch tile of TB image pairs.

    x_ref    : (TB, 1568) f32   row b = [first image (784) | second image (784)]
    wbig_ref : (1568, 128) bf16 block-diag: [:784,:64]=w1, [784:,64:]=w1
    b1_ref   : (1, 128)   f32   [b1 | b1]
    w2big_ref: (128, 20)  f32   block-diag folded (w2@wc): [:64,:10], [64:,10:]
    b2_ref   : (1, 20)    f32   [b2@wc+bc | b2@wc+bc]
    w20_ref  : (20, 20)   f32   lifted pairwise mask: w20[10+j, i] = 1 if i > j
    out_ref  : (1, TB)    f32   P(first digit > second digit), lane-dense
    """
    tb = x_ref.shape[0]

    # BaseModel MLP layer 1 for both halves at once (Dropout = identity in
    # eval).  x arrives f32 straight from HBM; cast to bf16 here for the MXU.
    x = x_ref[...].astype(jnp.bfloat16)                                  # (TB, 1568)
    h = jnp.dot(x, wbig_ref[...], preferred_element_type=jnp.float32) + b1_ref[...]
    h = jnp.maximum(h, 0.0)                                              # (TB, 128) = [h1 | h2]

    # Folded (embedding linear + classifier) layer, both halves at once.
    logits = jnp.dot(h, w2big_ref[...],
                     preferred_element_type=jnp.float32) + b2_ref[...]   # (TB, 20) = [l1 | l2]

    # Segmented (per-half) softmax over the two groups of 10 lanes, all f32.
    col = jax.lax.broadcasted_iota(jnp.int32, (tb, 2 * NUM_CLASSES), 1)
    grp1 = col < NUM_CLASSES
    m1 = jnp.max(jnp.where(grp1, logits, -jnp.inf), axis=-1, keepdims=True)
    m2 = jnp.max(jnp.where(grp1, -jnp.inf, logits), axis=-1, keepdims=True)
    e = jnp.exp(logits - jnp.where(grp1, m1, m2))
    s1 = jnp.sum(jnp.where(grp1, e, 0.0), axis=-1, keepdims=True)
    s2 = jnp.sum(jnp.where(grp1, 0.0, e), axis=-1, keepdims=True)
    probs20 = e / jnp.where(grp1, s1, s2)                                # [p1 | p2]

    # u[b, i] = sum_{j < i} p2_b[j] for i < 10, 0 otherwise.
    u = jnp.dot(probs20, w20_ref[...], preferred_element_type=jnp.float32)
    # P(first > second) = sum_i p1_b[i] * sum_{j<i} p2_b[j]
    res = jnp.sum(probs20 * u, axis=-1)                                  # (TB,)
    out_ref[...] = res[None, :]                                          # (1, TB) lane-dense


def weakly_supervised_forward(x, params, *, max_tile_b=1024):
    """x: (B, 2, 1, 28, 28) float32 -> (B, 1) float32.

    max_tile_b=1024 is safe on all generations with the 48 MiB VMEM limit
    below; 2048 also fits and can help on v6e/v7x for very large B.
    """
    B = x.shape[0]
    TB = min(max_tile_b, _round_up(B, 8))
    grid = pl.cdiv(B, TB)

    # Pure reshape (no copy, no transpose, no cast).  Row b of x2 is the
    # concatenation [first image | second image] of pair b.
    x2 = x.reshape(B, 2 * IMG_PIX)

    # ---- Fold & lift the weights once on the host side (all tiny). ----
    w1 = params["w1"].astype(jnp.float32)                        # (784, 64)
    b1 = params["b1"].astype(jnp.float32)                        # (1, 64)
    w2c = (params["w2"] @ params["wc"]).astype(jnp.float32)      # (64, 10)
    b2c = (params["b2"] @ params["wc"] + params["bc"]).astype(jnp.float32)

    wbig = jnp.zeros((2 * IMG_PIX, 2 * HIDDEN_DIM), jnp.float32)
    wbig = wbig.at[:IMG_PIX, :HIDDEN_DIM].set(w1)
    wbig = wbig.at[IMG_PIX:, HIDDEN_DIM:].set(w1)
    wbig = wbig.astype(jnp.bfloat16)                             # (1568, 128)
    b1cat = jnp.concatenate([b1, b1], axis=-1)                   # (1, 128)

    w2big = jnp.zeros((2 * HIDDEN_DIM, 2 * NUM_CLASSES), jnp.float32)
    w2big = w2big.at[:HIDDEN_DIM, :NUM_CLASSES].set(w2c)
    w2big = w2big.at[HIDDEN_DIM:, NUM_CLASSES:].set(w2c)         # (128, 20)
    b2cat = jnp.concatenate([b2c, b2c], axis=-1)                 # (1, 20)

    # Pairwise "first > second" mask lifted to the fused [p1 | p2] lanes:
    # w20[10 + j, i] = 1 if i > j (i, j in [0, 10)), 0 elsewhere.
    tri = jnp.triu(jnp.ones((NUM_CLASSES, NUM_CLASSES), jnp.float32), k=1)
    w20 = jnp.zeros((2 * NUM_CLASSES, 2 * NUM_CLASSES), jnp.float32)
    w20 = w20.at[NUM_CLASSES:, :NUM_CLASSES].set(tri)

    def resident(shape):
        # Full block, constant index_map -> stays VMEM-resident across steps.
        return pl.BlockSpec(shape, lambda i, _n=len(shape): (0,) * _n)

    flops = (2 * B * (2 * IMG_PIX) * (2 * HIDDEN_DIM)
             + 2 * B * (2 * HIDDEN_DIM) * (2 * NUM_CLASSES)
             + 2 * B * (2 * NUM_CLASSES) ** 2)
    bytes_accessed = (B * 2 * IMG_PIX * 4 + B * 4
                      + wbig.size * 2 + (b1cat.size + w2big.size + b2cat.size + w20.size) * 4)

    # TODO(synk): pipeline_mode=pl.Buffered(3) on the x spec is a possible
    # small extra win if a profile shows DMA-issue gaps at step boundaries.
    out_padded = pl.pallas_call(
        _ws_kernel,
        out_shape=jax.ShapeDtypeStruct((1, grid * TB), jnp.float32),
        grid=(grid,),
        in_specs=[
            pl.BlockSpec((TB, 2 * IMG_PIX), lambda i: (i, 0)),   # x tile (only per-step DMA)
            resident(wbig.shape),
            resident(b1cat.shape),
            resident(w2big.shape),
            resident(b2cat.shape),
            resident(w20.shape),
        ],
        out_specs=pl.BlockSpec((1, TB), lambda i: (0, i)),
        compiler_params=pltpu.CompilerParams(
            dimension_semantics=("parallel",),
            vmem_limit_bytes=48 * 1024 * 1024,   # v5e default 16 MiB is too small
        ),
        cost_estimate=pl.CostEstimate(
            flops=int(flops),
            transcendentals=int(2 * B * NUM_CLASSES),
            bytes_accessed=int(bytes_accessed)),
    )(x2, wbig, b1cat, w2big, b2cat, w20)

    return out_padded[0, :B].reshape(B, 1)


def init_params(key):
    k1, k2, k3 = jax.random.split(key, 3)
    s1 = 1.0 / jnp.sqrt(IMG_PIX)
    s2 = 1.0 / jnp.sqrt(HIDDEN_DIM)
    s3 = 1.0 / jnp.sqrt(EMBED_DIM)
    return {
        # stored as (in, out) so the model does x @ W
        "w1": jax.random.uniform(k1, (IMG_PIX, HIDDEN_DIM), jnp.float32, -s1, s1),
        "b1": jnp.zeros((1, HIDDEN_DIM), jnp.float32),
        "w2": jax.random.uniform(k2, (HIDDEN_DIM, EMBED_DIM), jnp.float32, -s2, s2),
        "b2": jnp.zeros((1, EMBED_DIM), jnp.float32),
        "wc": jax.random.uniform(k3, (EMBED_DIM, NUM_CLASSES), jnp.float32, -s3, s3),
        "bc": jnp.zeros((1, NUM_CLASSES), jnp.float32),
    }


def _reference_forward(x, p):
    """Pure-JAX, all-f32 reference of the PyTorch forward."""
    B = x.shape[0]
    xf = x.reshape(B, 2, IMG_PIX)

    def class_probs(v):
        h = jnp.maximum(v @ p["w1"] + p["b1"], 0.0)
        emb = h @ p["w2"] + p["b2"]              # Dropout is identity in eval
        logits = emb @ p["wc"] + p["bc"]
        return jax.nn.softmax(logits, axis=-1)

    p1 = class_probs(xf[:, 0])
    p2 = class_probs(xf[:, 1])
    mask_greater = jnp.tril(jnp.ones((NUM_CLASSES, NUM_CLASSES), jnp.float32), k=-1)
    return jnp.einsum("bi,ij,bj->b", p1, mask_greater, p2)[:, None]


if __name__ == "__main__":
    key = jax.random.PRNGKey(0)
    pkey, xkey = jax.random.split(key)
    params = init_params(pkey)

    B = 8
    x = jax.random.normal(xkey, (B, 2, 1, 28, 28), jnp.float32)

    out = jax.block_until_ready(weakly_supervised_forward(x, params))

    assert out.shape == (B, 1), out.shape
    assert bool(jnp.all(jnp.isfinite(out)))
    # probabilities of a strict ordering must lie in [0, 1]
    assert bool(jnp.all(out >= -1e-3)) and bool(jnp.all(out <= 1.0 + 1e-3))
    # parity with an all-f32 pure-JAX reference (bf16 only on the first matmul)
    ref = jax.block_until_ready(_reference_forward(x, params))
    assert bool(jnp.allclose(out, ref, atol=5e-3)), (out, ref)
    print("KERNEL_OK")
</pallas_src>

<mosaic_0001>
module attributes {stable_mosaic.version = 11 : i64} {
  func.func @_ws_kernel(%arg0: i32, %arg1: memref<8x1568xf32, #tpu.memory_space<vmem>>, %arg2: memref<1568x128xbf16, #tpu.memory_space<vmem>>, %arg3: memref<1x128xf32, #tpu.memory_space<vmem>>, %arg4: memref<128x20xf32, #tpu.memory_space<vmem>>, %arg5: memref<1x20xf32, #tpu.memory_space<vmem>>, %arg6: memref<20x20xf32, #tpu.memory_space<vmem>>, %arg7: memref<1x8xf32, #tpu.memory_space<vmem>>) attributes {dimension_semantics = [#tpu.dimension_semantics<parallel>], iteration_bounds = array<i64: 1>, scalar_prefetch = 0 : i64, scratch_operands = 0 : i64, tpu.core_type = #tpu.core_type<tc>, window_params = [{transform_indices = @transform_0, window_bounds = array<i64: 8, 1568>}, {pipeline_mode = #tpu.pipeline_mode<synchronous>, transform_indices = @transform_1, window_bounds = array<i64: 1568, 128>}, {pipeline_mode = #tpu.pipeline_mode<synchronous>, transform_indices = @transform_2, window_bounds = array<i64: 1, 128>}, {pipeline_mode = #tpu.pipeline_mode<synchronous>, transform_indices = @transform_3, window_bounds = array<i64: 128, 20>}, {pipeline_mode = #tpu.pipeline_mode<synchronous>, transform_indices = @transform_4, window_bounds = array<i64: 1, 20>}, {pipeline_mode = #tpu.pipeline_mode<synchronous>, transform_indices = @transform_5, window_bounds = array<i64: 20, 20>}, {transform_indices = @transform_6, window_bounds = array<i64: 1, 8>}]} {
    %c0 = arith.constant 0 : index
    %c0_0 = arith.constant 0 : index
    %0 = vector.load %arg1[%c0, %c0_0] : memref<8x1568xf32, #tpu.memory_space<vmem>>, vector<8x1568xf32>
    %1 = arith.truncf %0 : vector<8x1568xf32> to vector<8x1568xbf16>
    %c0_1 = arith.constant 0 : index
    %c0_2 = arith.constant 0 : index
    %2 = vector.load %arg2[%c0_1, %c0_2] : memref<1568x128xbf16, #tpu.memory_space<vmem>>, vector<1568x128xbf16>
    %cst = arith.constant dense<0.000000e+00> : vector<8x128xf32>
    %3 = tpu.matmul %1, %2, %cst {dimension_numbers = #tpu.dot_dimension_numbers<[1], [0], [0], [1], [0, 0, 1, 1], [], []>} : vector<8x1568xbf16>, vector<1568x128xbf16>, vector<8x128xf32> -> vector<8x128xf32>
    %c0_3 = arith.constant 0 : index
    %c0_4 = arith.constant 0 : index
    %4 = vector.load %arg3[%c0_3, %c0_4] : memref<1x128xf32, #tpu.memory_space<vmem>>, vector<1x128xf32>
    %5 = vector.broadcast %4 : vector<1x128xf32> to vector<8x128xf32>
    %6 = arith.addf %3, %5 : vector<8x128xf32>
    %cst_5 = arith.constant 0.000000e+00 : f32
    %7 = vector.broadcast %cst_5 : f32 to vector<8x128xf32>
    %8 = arith.maximumf %6, %7 : vector<8x128xf32>
    %c0_6 = arith.constant 0 : index
    %c0_7 = arith.constant 0 : index
    %9 = vector.load %arg4[%c0_6, %c0_7] : memref<128x20xf32, #tpu.memory_space<vmem>>, vector<128x20xf32>
    %cst_8 = arith.constant dense<0.000000e+00> : vector<8x20xf32>
    %10 = tpu.matmul %8, %9, %cst_8 {dimension_numbers = #tpu.dot_dimension_numbers<[1], [0], [0], [1], [0, 0, 1, 1], [], []>} : vector<8x128xf32>, vector<128x20xf32>, vector<8x20xf32> -> vector<8x20xf32>
    %c0_9 = arith.constant 0 : index
    %c0_10 = arith.constant 0 : index
    %11 = vector.load %arg5[%c0_9, %c0_10] : memref<1x20xf32, #tpu.memory_space<vmem>>, vector<1x20xf32>
    %12 = vector.broadcast %11 : vector<1x20xf32> to vector<8x20xf32>
    %13 = arith.addf %10, %12 : vector<8x20xf32>
    %14 = tpu.iota {dimensions = array<i32: 1>} : vector<8x20xi32>
    %c10_i32 = arith.constant 10 : i32
    %15 = vector.broadcast %c10_i32 : i32 to vector<8x20xi32>
    %16 = arith.cmpi slt, %14, %15 : vector<8x20xi32>
    %cst_11 = arith.constant 0xFF800000 : f32
    %17 = vector.broadcast %cst_11 : f32 to vector<8x20xf32>
    %18 = arith.select %16, %13, %17 : vector<8x20xi1>, vector<8x20xf32>
    %cst_12 = arith.constant dense<0xFF800000> : vector<8xf32>
    %19 = vector.multi_reduction <maximumf>, %18, %cst_12 [1] : vector<8x20xf32> to vector<8xf32>
    %20 = vector.shape_cast %19 : vector<8xf32> to vector<8x1xf32>
    %cst_13 = arith.constant 0xFF800000 : f32
    %21 = vector.broadcast %cst_13 : f32 to vector<8x20xf32>
    %22 = arith.select %16, %21, %13 : vector<8x20xi1>, vector<8x20xf32>
    %cst_14 = arith.constant dense<0xFF800000> : vector<8xf32>
    %23 = vector.multi_reduction <maximumf>, %22, %cst_14 [1] : vector<8x20xf32> to vector<8xf32>
    %24 = vector.shape_cast %23 : vector<8xf32> to vector<8x1xf32>
    %25 = vector.shape_cast %20 : vector<8x1xf32> to vector<8x1xf32>
    %26 = vector.broadcast %25 : vector<8x1xf32> to vector<8x20xf32>
    %27 = vector.shape_cast %24 : vector<8x1xf32> to vector<8x1xf32>
    %28 = vector.broadcast %27 : vector<8x1xf32> to vector<8x20xf32>
    %29 = arith.select %16, %26, %28 : vector<8x20xi1>, vector<8x20xf32>
    %30 = arith.subf %13, %29 : vector<8x20xf32>
    %31 = math.exp %30 : vector<8x20xf32>
    %cst_15 = arith.constant 0.000000e+00 : f32
    %32 = vector.broadcast %cst_15 : f32 to vector<8x20xf32>
    %33 = arith.select %16, %31, %32 : vector<8x20xi1>, vector<8x20xf32>
    %cst_16 = arith.constant dense<0.000000e+00> : vector<8xf32>
    %34 = vector.multi_reduction <add>, %33, %cst_16 [1] : vector<8x20xf32> to vector<8xf32>
    %35 = vector.shape_cast %34 : vector<8xf32> to vector<8x1xf32>
    %cst_17 = arith.constant 0.000000e+00 : f32
    %36 = vector.broadcast %cst_17 : f32 to vector<8x20xf32>
    %37 = arith.select %16, %36, %31 : vector<8x20xi1>, vector<8x20xf32>
    %cst_18 = arith.constant dense<0.000000e+00> : vector<8xf32>
    %38 = vector.multi_reduction <add>, %37, %cst_18 [1] : vector<8x20xf32> to vector<8xf32>
    %39 = vector.shape_cast %38 : vector<8xf32> to vector<8x1xf32>
    %40 = vector.shape_cast %35 : vector<8x1xf32> to vector<8x1xf32>
    %41 = vector.broadcast %40 : vector<8x1xf32> to vector<8x20xf32>
    %42 = vector.shape_cast %39 : vector<8x1xf32> to vector<8x1xf32>
    %43 = vector.broadcast %42 : vector<8x1xf32> to vector<8x20xf32>
    %44 = arith.select %16, %41, %43 : vector<8x20xi1>, vector<8x20xf32>
    %45 = arith.divf %31, %44 : vector<8x20xf32>
    %c0_19 = arith.constant 0 : index
    %c0_20 = arith.constant 0 : index
    %46 = vector.load %arg6[%c0_19, %c0_20] : memref<20x20xf32, #tpu.memory_space<vmem>>, vector<20x20xf32>
    %cst_21 = arith.constant dense<0.000000e+00> : vector<8x20xf32>
    %47 = tpu.matmul %45, %46, %cst_21 {dimension_numbers = #tpu.dot_dimension_numbers<[1], [0], [0], [1], [0, 0, 1, 1], [], []>} : vector<8x20xf32>, vector<20x20xf32>, vector<8x20xf32> -> vector<8x20xf32>
    %48 = arith.mulf %45, %47 : vector<8x20xf32>
    %cst_22 = arith.constant dense<0.000000e+00> : vector<8xf32>
    %49 = vector.multi_reduction <add>, %48, %cst_22 [1] : vector<8x20xf32> to vector<8xf32>
    %50 = vector.shape_cast %49 : vector<8xf32> to vector<1x8xf32>
    %c0_23 = arith.constant 0 : index
    %c0_24 = arith.constant 0 : index
    %51 = vector.load %arg7[%c0_23, %c0_24] : memref<1x8xf32, #tpu.memory_space<vmem>>, vector<1x8xf32>
    tpu.vector_store %arg7[%c0_23, %c0_24], %50 {strides = array<i32>} : memref<1x8xf32, #tpu.memory_space<vmem>>, vector<1x8xf32>,
    return
  }
  func.func @transform_0(%arg0: i32) -> (i32, i32) {
    %c0_i32 = arith.constant 0 : i32
    %c0_i32_0 = arith.constant 0 : i32
    return %arg0, %c0_i32 : i32, i32
  }
  func.func @transform_1(%arg0: i32) -> (i32, i32) {
    %c0_i32 = arith.constant 0 : i32
    %c0_i32_0 = arith.constant 0 : i32
    %c0_i32_1 = arith.constant 0 : i32
    return %c0_i32, %c0_i32_0 : i32, i32
  }
  func.func @transform_2(%arg0: i32) -> (i32, i32) {
    %c0_i32 = arith.constant 0 : i32
    %c0_i32_0 = arith.constant 0 : i32
    %c0_i32_1 = arith.constant 0 : i32
    return %c0_i32, %c0_i32_0 : i32, i32
  }
  func.func @transform_3(%arg0: i32) -> (i32, i32) {
    %c0_i32 = arith.constant 0 : i32
    %c0_i32_0 = arith.constant 0 : i32
    %c0_i32_1 = arith.constant 0 : i32
    return %c0_i32, %c0_i32_0 : i32, i32
  }
  func.func @transform_4(%arg0: i32) -> (i32, i32) {
    %c0_i32 = arith.constant 0 : i32
    %c0_i32_0 = arith.constant 0 : i32
    %c0_i32_1 = arith.constant 0 : i32
    return %c0_i32, %c0_i32_0 : i32, i32
  }
  func.func @transform_5(%arg0: i32) -> (i32, i32) {
    %c0_i32 = arith.constant 0 : i32
    %c0_i32_0 = arith.constant 0 : i32
    %c0_i32_1 = arith.constant 0 : i32
    return %c0_i32, %c0_i32_0 : i32, i32
  }
  func.func @transform_6(%arg0: i32) -> (i32, i32) {
    %c0_i32 = arith.constant 0 : i32
    %c0_i32_0 = arith.constant 0 : i32
    return %c0_i32, %arg0 : i32, i32
  }
}

</mosaic_0001>

<bundles_post_ra>
// kernel: tpu_custom_call.1
= control target key start
LH: loop header
LB: loop body
LE: loop exit
PB: predicated region body
PF: predicated region fallthrough
CT: control target
= control target key end

     0   :  { %11 = vsyncpa [#allocation3], 0  ;;  %s2049_s0 = inlined_call_operand.vmem [shape: f32[8,1568], index: 0, kind: input, shape index: {}]   ;;  %s2050_s1 = inlined_call_operand.hbm [shape: bf16[1568,128], index: 1, kind: input, shape index: {}]   ;;  %s2051_s2 = inlined_call_operand.vmem [shape: f32[1,128], index: 2, kind: input, shape index: {}]   ;;  %s2052_s3 = inlined_call_operand.vmem [shape: f32[128,20], index: 3, kind: input, shape index: {}]   ;;  %s2053_s4 = inlined_call_operand.vmem [shape: f32[1,20], index: 4, kind: input, shape index: {}]   ;;  %s2054_s5 = inlined_call_operand.vmem [shape: f32[20,20], index: 5, kind: input, shape index: {}]   ;;  %s2055_s6 = inlined_call_operand.hbm [shape: f32[1,8], index: 6, kind: output, shape index: {}]  }
   0x1   :  { %12 = vsyncpa [#allocation4], 0  ;;  %s1863_s21 = smov [#allocation2]   ;;  %s1815_s25 = scalar_lea.hbm %s2050_s1, 12544 }
   0x2   :  { %s20_s22 = sshll.u32 %s1863_s21, 4  ;;  %p1816_p0 = scmp.ne.s32.totalorder %s2050_s1, %s1815_s25  ;;  %s21_s22 = int_to_ptr.vmem [resolvable:$true] %s20_s22 }
   0x3   :  { %p1819_p1 = scmp.lt.u32.totalorder %s1815_s25, %s2050_s1 }
   0x5   :  { %p1821_p2 = pnand %p1819_p1, %p1816_p0 }
   0x7   :  { %1824 = shalt.err (!%p1821_p2)
}
   0x8   :  { %s1825_s30 = scalar_lea.vmem %s21_s22, 12544  ;;  %p1830_p4 = scmp.lt.s32.totalorder %s21_s22, %s21_s22 }
   0x9   :  { %p1826_p3 = scmp.ne.s32.totalorder %s21_s22, %s1825_s30  ;;  %p1831_p5 = scmp.lt.s32.totalorder %s1825_s30, %s1825_s30 }
   0xb   :  { %p1832_p6 = por %p1831_p5, %p1830_p4 }
   0xd   :  { %p1833_p7 = pnand %p1832_p6, %p1826_p3 }
   0xf   :  { %1836 = shalt.err (!%p1833_p7)
}
  0x10   :  { %s1864_s7 = smov 64   ;;  %s1865_s8 = smov 4  }
  0x11   :  { %26 = dma.hbm_to_vmem [thread:$0]  %s2050_s1, 12544, %s21_s22, [#allocation3], %s1864_s7, %s1864_s7, %s1865_s8  }
  0x12   :  { %1859 = dma.done.wait [#allocation3], 12544  }
  0x13   :  { %1860 = vsyncadd [#allocation3], 4294954752  ;;  %v1713_v0 = vld [vmem:[#allocation2 + $0x40] sm:$0xff]   ;;  %v1717_v4 = vld [vmem:[#allocation2 + $0x48] sm:$0xff]   ;;  %vm1867_vm0 = vmmov 0   ;;  %vm856_vm1 = vcmask 261120  }
  0x14   :  { %v1714_v1 = vld [vmem:[#allocation2] sm:$0xff]   ;;  %1471 = vmatprep.subr.bf16.mxu0 %v1713_v0  ;;  %v1718_v5 = vld [vmem:[#allocation2 + $0x8] sm:$0xff]   ;;  %v1721_v8 = vld [vmem:[#allocation2 + $0x50] sm:$0xff]   ;;  %vm1238_vm3 = vcmask 162816   ;;  %vm1267_vm4 = vcmask 1043456   ;;  %vm1351_vm5 = vcmask 57344  }
  0x15   :  { %v1715_v2 = vld [vmem:[#allocation2 + $0xc0] sm:$0xff]   ;;  %1472 = vmatpush3.bf16.msra.mxu0 %v1714_v1  ;;  %v1719_v6 = vld [vmem:[#allocation2 + $0xc8] sm:$0xff]   ;;  %v1722_v9 = vld [vmem:[#allocation2 + $0x10] sm:$0xff]  }
  0x16   :  { %v1716_v3 = vld [vmem:[#allocation2 + $0x80] sm:$0xff]   ;;  %1493 = vmatprep.subr.bf16.mxu1 %v1715_v2  ;;  %1473 = vmatprep.subr.bf16.mxu0 %v1717_v4  ;;  %v1720_v7 = vld [vmem:[#allocation2 + $0x88] sm:$0xff]   ;;  %v1723_v10 = vld [vmem:[#allocation2 + $0xd0] sm:$0xff]  }
  0x17   :  { %1494 = vmatpush3.bf16.msra.mxu1 %v1716_v3  ;;  %v1724_v11 = vld [vmem:[#allocation2 + $0x90] sm:$0xff]   ;;  %v1725_v12 = vld [vmem:[#allocation2 + $0x58] sm:$0xff]   ;;  %v1729_v16 = vld [vmem:[#allocation2 + $0x60] sm:$0xff]  }
  0x18   :  { %1495 = vmatprep.subr.bf16.mxu1 %v1719_v6  ;;  %v1726_v13 = vld [vmem:[#allocation2 + $0x18] sm:$0xff]   ;;  %v1730_v17 = vld [vmem:[#allocation2 + $0x20] sm:$0xff]   ;;  %v1733_v20 = vld [vmem:[#allocation2 + $0x68] sm:$0xff]  }
  0x19   :  { %1474 = vmatpush3.bf16.msra.mxu0 %v1718_v5  ;;  %v1727_v14 = vld [vmem:[#allocation2 + $0xd8] sm:$0xff]   ;;  %v1731_v18 = vld [vmem:[#allocation2 + $0xe0] sm:$0xff]   ;;  %v1734_v21 = vld [vmem:[#allocation2 + $0x28] sm:$0xff]  }
  0x1a   :  { %1475 = vmatprep.subr.bf16.mxu0 %v1721_v8  ;;  %v1728_v15 = vld [vmem:[#allocation2 + $0x98] sm:$0xff]   ;;  %v1732_v19 = vld [vmem:[#allocation2 + $0xa0] sm:$0xff]   ;;  %v1735_v22 = vld [vmem:[#allocation2 + $0xe8] sm:$0xff]  }
  0x1b   :  { %1496 = vmatpush3.bf16.msra.mxu1 %v1720_v7  ;;  %v1736_v23 = vld [vmem:[#allocation2 + $0xa8] sm:$0xff]   ;;  %v1737_v24 = vld [vmem:[#allocation2 + $0x70] sm:$0xff]   ;;  %v1741_v28 = vld [vmem:[#allocation2 + $0x78] sm:$0xff]  }
  0x1c   :  { %1497 = vmatprep.subr.bf16.mxu1 %v1723_v10  ;;  %v1738_v25 = vld [vmem:[#allocation2 + $0x30] sm:$0xff]   ;;  %v1742_v29 = vld [vmem:[#allocation2 + $0x38] sm:$0xff]   ;;  %v40_v32 = vld [vmem:[%s2049_s0 + $0x8] sm:$0xff] }
  0x1d   :  { %1476 = vmatpush3.bf16.msra.mxu0 %v1722_v9  ;;  %v1739_v26 = vld [vmem:[#allocation2 + $0xf0] sm:$0xff]   ;;  %v1743_v30 = vld [vmem:[#allocation2 + $0xf8] sm:$0xff]   ;;  %v39_v33 = vld [vmem:[%s2049_s0] sm:$0xff]  ;;  %v53_v34 = vpack.c.bf16 %v40_v32, %v40_v32 }
  0x1e   :  { %1477 = vmatprep.subr.bf16.mxu0 %v1725_v12  ;;  %v1740_v27 = vld [vmem:[#allocation2 + $0xb0] sm:$0xff]   ;;  %v1744_v31 = vld [vmem:[#allocation2 + $0xb8] sm:$0xff]   ;;  %v52_v35 = vpack.c.bf16 %v39_v33, %v39_v33  ;;  %v1745_v36 = vld [vmem:[#allocation2 + $0x140] sm:$0xff]  }
  0x1f   :  { %1498 = vmatpush3.bf16.msra.mxu1 %v1724_v11  ;;  %v42_v37 = vld [vmem:[%s2049_s0 + $0x18] sm:$0xff]  ;;  %v1746_v39 = vld [vmem:[#allocation2 + $0x100] sm:$0xff]   ;;  %892 = vmatprep.mubr.bf16.mxu0 %v53_v34  ;;  %v41_v41 = vld [vmem:[%s2049_s0 + $0x10] sm:$0xff] }
  0x20   :  { %1499 = vmatprep.subr.bf16.mxu1 %v1727_v14  ;;  %v55_v38 = vpack.c.bf16 %v42_v37, %v42_v37  ;;  %v1747_v40 = vld [vmem:[#allocation2 + $0x1c0] sm:$0xff]   ;;  %v54_v42 = vpack.c.bf16 %v41_v41, %v41_v41  ;;  %v1749_v44 = vld [vmem:[#allocation2 + $0x148] sm:$0xff]   ;;  %v1753_v48 = vld [vmem:[#allocation2 + $0x150] sm:$0xff]  }
  0x21   :  { %1478 = vmatpush3.bf16.msra.mxu0 %v1726_v13  ;;  %v1748_v43 = vld [vmem:[#allocation2 + $0x180] sm:$0xff]   ;;  %v1750_v45 = vld [vmem:[#allocation2 + $0x108] sm:$0xff]   ;;  %v1754_v49 = vld [vmem:[#allocation2 + $0x110] sm:$0xff]  }
  0x22   :  { %1479 = vmatprep.subr.bf16.mxu0 %v1729_v16  ;;  %932 = vmatprep.mubr.bf16.mxu1 %v55_v38  ;;  %v1751_v46 = vld [vmem:[#allocation2 + $0x1c8] sm:$0xff]   ;;  %v1755_v50 = vld [vmem:[#allocation2 + $0x1d0] sm:$0xff]   ;;  %v1757_v52 = vld [vmem:[#allocation2 + $0x158] sm:$0xff]  }
  0x23   :  { %1500 = vmatpush3.bf16.msra.mxu1 %v1728_v15  ;;  %v1752_v47 = vld [vmem:[#allocation2 + $0x188] sm:$0xff]   ;;  %v1756_v51 = vld [vmem:[#allocation2 + $0x190] sm:$0xff]   ;;  %v1758_v53 = vld [vmem:[#allocation2 + $0x118] sm:$0xff]  }
  0x24   :  { %1501 = vmatprep.subr.bf16.mxu1 %v1731_v18  ;;  %v1759_v54 = vld [vmem:[#allocation2 + $0x1d8] sm:$0xff]   ;;  %v1761_v56 = vld [vmem:[#allocation2 + $0x160] sm:$0xff]   ;;  %v1765_v60 = vld [vmem:[#allocation2 + $0x168] sm:$0xff]  }
  0x25   :  { %1480 = vmatpush3.bf16.msra.mxu0 %v1730_v17  ;;  %v1760_v55 = vld [vmem:[#allocation2 + $0x198] sm:$0xff]   ;;  %v1762_v57 = vld [vmem:[#allocation2 + $0x120] sm:$0xff]   ;;  %v1766_v61 = vld [vmem:[#allocation2 + $0x128] sm:$0xff]  }
  0x26   :  { %1481 = vmatprep.subr.bf16.mxu0 %v1733_v20  ;;  %v1763_v58 = vld [vmem:[#allocation2 + $0x1e0] sm:$0xff]   ;;  %v1767_v62 = vld [vmem:[#allocation2 + $0x1e8] sm:$0xff]   ;;  %v1769_v0 = vld [vmem:[#allocation2 + $0x170] sm:$0xff]  }
  0x27   :  { %1502 = vmatpush3.bf16.msra.mxu1 %v1732_v19  ;;  %v1764_v59 = vld [vmem:[#allocation2 + $0x1a0] sm:$0xff]   ;;  %v1768_v63 = vld [vmem:[#allocation2 + $0x1a8] sm:$0xff]   ;;  %v1770_v1 = vld [vmem:[#allocation2 + $0x130] sm:$0xff]  }
  0x28   :  { %1503 = vmatprep.subr.bf16.mxu1 %v1735_v22  ;;  %v1771_v2 = vld [vmem:[#allocation2 + $0x1f0] sm:$0xff]   ;;  %v1773_v4 = vld [vmem:[#allocation2 + $0x178] sm:$0xff]   ;;  %v44_v8 = vld [vmem:[%s2049_s0 + $0x28] sm:$0xff] }
  0x29   :  { %1482 = vmatpush3.bf16.msra.mxu0 %v1734_v21  ;;  %v1772_v3 = vld [vmem:[#allocation2 + $0x1b0] sm:$0xff]   ;;  %v1774_v5 = vld [vmem:[#allocation2 + $0x138] sm:$0xff]   ;;  %v43_v9 = vld [vmem:[%s2049_s0 + $0x20] sm:$0xff]  ;;  %v57_v10 = vpack.c.bf16 %v44_v8, %v44_v8 }
  0x2a   :  { %1483 = vmatprep.subr.bf16.mxu0 %v1737_v24  ;;  %v1775_v6 = vld [vmem:[#allocation2 + $0x1f8] sm:$0xff]   ;;  %v56_v11 = vpack.c.bf16 %v43_v9, %v43_v9  ;;  %v1777_v12 = vld [vmem:[#allocation2 + $0x240] sm:$0xff]   ;;  %v45_v17 = vld [vmem:[%s2049_s0 + $0x30] sm:$0xff] }
  0x2b   :  { %1504 = vmatpush3.bf16.msra.mxu1 %v1736_v23  ;;  %v1776_v7 = vld [vmem:[#allocation2 + $0x1b8] sm:$0xff]   ;;  %v1778_v15 = vld [vmem:[#allocation2 + $0x200] sm:$0xff]   ;;  %v58_v18 = vpack.c.bf16 %v45_v17, %v45_v17  ;;  %v1781_v20 = vld [vmem:[#allocation2 + $0x248] sm:$0xff]  }
  0x2c   :  { %1505 = vmatprep.subr.bf16.mxu1 %v1739_v26  ;;  %v46_v13 = vld [vmem:[%s2049_s0 + $0x38] sm:$0xff]  ;;  %v1779_v16 = vld [vmem:[#allocation2 + $0x2c0] sm:$0xff]   ;;  %v1782_v21 = vld [vmem:[#allocation2 + $0x208] sm:$0xff]  }
  0x2d   :  { %1484 = vmatpush3.bf16.msra.mxu0 %v1738_v25  ;;  %v59_v14 = vpack.c.bf16 %v46_v13, %v46_v13  ;;  %v1780_v19 = vld [vmem:[#allocation2 + $0x280] sm:$0xff]   ;;  %v1783_v22 = vld [vmem:[#allocation2 + $0x2c8] sm:$0xff]   ;;  %v1785_v24 = vld [vmem:[#allocation2 + $0x250] sm:$0xff]  }
  0x2e   :  { %1485 = vmatprep.subr.bf16.mxu0 %v1741_v28  ;;  %v1784_v23 = vld [vmem:[#allocation2 + $0x288] sm:$0xff]   ;;  %v1786_v25 = vld [vmem:[#allocation2 + $0x210] sm:$0xff]   ;;  %v1789_v28 = vld [vmem:[#allocation2 + $0x258] sm:$0xff]  }
  0x2f   :  { %1506 = vmatpush3.bf16.msra.mxu1 %v1740_v27  ;;  %v1787_v26 = vld [vmem:[#allocation2 + $0x2d0] sm:$0xff]   ;;  %v1793_v32 = vld [vmem:[#allocation2 + $0x260] sm:$0xff]   ;;  %v1798_v37 = vld [vmem:[#allocation2 + $0x228] sm:$0xff]  }
  0x30   :  { %1507 = vmatprep.subr.bf16.mxu1 %v1743_v30  ;;  %v1788_v27 = vld [vmem:[#allocation2 + $0x290] sm:$0xff]   ;;  %v1791_v30 = vld [vmem:[#allocation2 + $0x2d8] sm:$0xff]   ;;  %v1794_v33 = vld [vmem:[#allocation2 + $0x220] sm:$0xff]  }
  0x31   :  { %1486 = vmatpush3.bf16.msra.mxu0 %v1742_v29  ;;  %v1790_v29 = vld [vmem:[#allocation2 + $0x218] sm:$0xff]   ;;  %v1795_v34 = vld [vmem:[#allocation2 + $0x2e0] sm:$0xff]   ;;  %v1799_v38 = vld [vmem:[#allocation2 + $0x2e8] sm:$0xff]  }
  0x32   :  { %1515 = vmatprep.subr.bf16.mxu0 %v1745_v36  ;;  %v1797_v36 = vld [vmem:[#allocation2 + $0x268] sm:$0xff]   ;;  %v1802_v41 = vld [vmem:[#allocation2 + $0x230] sm:$0xff]   ;;  %v1148_v8 = vld [vmem:[%s2052_s3 + $0x38] sm:$0xff] }
  0x33   :  { %1508 = vmatpush3.bf16.msra.mxu1 %v1744_v31  ;;  %v1792_v31 = vld [vmem:[#allocation2 + $0x298] sm:$0xff]   ;;  %v1151_v13 = vld [vmem:[%s2052_s3 + $0x50] sm:$0xff]  ;;  %v1154_v17 = vld [vmem:[%s2052_s3 + $0x68] sm:$0xff] }
  0x34   :  { %893 = vmatmul.mubr.bf16.vlgmr.msra.gmra.mrb[0].mxu0 %v52_v35  ;;  %1537 = vmatprep.subr.bf16.mxu1 %v1747_v40  ;;  %v1796_v35 = vld [vmem:[#allocation2 + $0x2a0] sm:$0xff]   ;;  %v1801_v40 = vld [vmem:[#allocation2 + $0x270] sm:$0xff]  }
  0x35   :  { %1516 = vmatpush3.bf16.msra.mxu0 %v1746_v39  ;;  %972 = vmatprep.mubr.bf16.mxu0 %v57_v10  ;;  %v1800_v39 = vld [vmem:[#allocation2 + $0x2a8] sm:$0xff]   ;;  %v1149_v10 = vld [vmem:[%s2052_s3 + $0x40] sm:$0xff] }
  0x36   :  { %933 = vmatmul.mubr.bf16.vlgmr.msra.gmra.mrb[0].mxu1 %v54_v42  ;;  %1517 = vmatprep.subr.bf16.mxu0 %v1749_v44  ;;  %v1803_v42 = vld [vmem:[#allocation2 + $0x2f0] sm:$0xff]   ;;  %v1805_v44 = vld [vmem:[#allocation2 + $0x278] sm:$0xff]  }
  0x37   :  { %1538 = vmatpush3.bf16.msra.mxu1 %v1748_v43  ;;  %1012 = vmatprep.mubr.bf16.mxu1 %v59_v14  ;;  %v1804_v43 = vld [vmem:[#allocation2 + $0x2b0] sm:$0xff]   ;;  %v1152_v14 = vld [vmem:[%s2052_s3 + $0x58] sm:$0xff] }
  0x38   :  { %1539 = vmatprep.subr.bf16.mxu1 %v1751_v46  ;;  %v1807_v46 = vld [vmem:[#allocation2 + $0x2f8] sm:$0xff]  }
  0x39   :  { %1518 = vmatpush3.bf16.msra.mxu0 %v1750_v45  ;;  %v1806_v45 = vld [vmem:[#allocation2 + $0x238] sm:$0xff]  }
  0x3a   :  { %1519 = vmatprep.subr.bf16.mxu0 %v1753_v48  ;;  %v48_v48 = vld [vmem:[%s2049_s0 + $0x48] sm:$0xff] }
  0x3b   :  { %1540 = vmatpush3.bf16.msra.mxu1 %v1752_v47  ;;  %v1808_v47 = vld [vmem:[#allocation2 + $0x2b8] sm:$0xff]  }
  0x3c   :  { %1541 = vmatprep.subr.bf16.mxu1 %v1755_v50  ;;  %v47_v50 = vld [vmem:[%s2049_s0 + $0x40] sm:$0xff] }
  0x3d   :  { %1520 = vmatpush3.bf16.msra.mxu0 %v1754_v49  ;;  %v61_v49 = vpack.c.bf16 %v48_v48, %v48_v48 }
  0x3e   :  { %1521 = vmatprep.subr.bf16.mxu0 %v1757_v52  ;;  %v1866_v52 = vmov 0.0  }
  0x3f   :  { %1542 = vmatpush3.bf16.msra.mxu1 %v1756_v51  ;;  %v50_v51 = vld [vmem:[%s2049_s0 + $0x58] sm:$0xff] }
  0x40   :  { %1543 = vmatprep.subr.bf16.mxu1 %v1759_v54  ;;  %v60_v54 = vpack.c.bf16 %v47_v50, %v47_v50 }
  0x41   :  { %1522 = vmatpush3.bf16.msra.mxu0 %v1758_v53  ;;  %v49_v53 = vld [vmem:[%s2049_s0 + $0x50] sm:$0xff] }
  0x42   :  { %1523 = vmatprep.subr.bf16.mxu0 %v1761_v56  ;;  %v62_v56 = vpack.c.bf16 %v49_v53, %v49_v53 }
  0x43   :  { %1544 = vmatpush3.bf16.msra.mxu1 %v1760_v55  ;;  %v63_v55 = vpack.c.bf16 %v50_v51, %v50_v51 }
  0x44   :  { %1545 = vmatprep.subr.bf16.mxu1 %v1763_v58  ;;  %v1810_v58 = vld [vmem:[#allocation2 + $0x308] sm:$0xff]  }
  0x45   :  { %1524 = vmatpush3.bf16.msra.mxu0 %v1762_v57  ;;  %v1809_v57 = vld [vmem:[#allocation2 + $0x300] sm:$0xff]  }
  0x46   :  { %1525 = vmatprep.subr.bf16.mxu0 %v1765_v60 }
  0x47   :  { %1546 = vmatpush3.bf16.msra.mxu1 %v1764_v59  ;;  %v51_v59 = vld [vmem:[%s2049_s0 + $0x60] sm:$0xff] }
  0x48   :  { %1547 = vmatprep.subr.bf16.mxu1 %v1767_v62  ;;  %v64_v60 = vpack.c.bf16 %v51_v59, %v51_v59  ;;  %v1142_v62 = vld [vmem:[%s2052_s3 + $0x8] sm:$0xff] }
  0x49   :  { %1526 = vmatpush3.bf16.msra.mxu0 %v1766_v61  ;;  %v1141_v61 = vld [vmem:[%s2052_s3] sm:$0xff] }
  0x4a   :  { %1527 = vmatprep.subr.bf16.mxu0 %v1769_v0  ;;  %v1868_v0 = vmov 0.0|0.0  }
  0x4b   :  { %1548 = vmatpush3.bf16.msra.mxu1 %v1768_v63  ;;  %v1143_v63 = vld [vmem:[%s2052_s3 + $0x10] sm:$0xff] }
  0x4c   :  { %1549 = vmatprep.subr.bf16.mxu1 %v1771_v2  ;;  %v1144_v2 = vld [vmem:[%s2052_s3 + $0x18] sm:$0xff] }
  0x4d   :  { %1528 = vmatpush3.bf16.msra.mxu0 %v1770_v1  ;;  %v1680_v1 = vpack.c.bf16 %v1142_v62, %v1141_v61 }
  0x4e   :  { %1529 = vmatprep.subr.bf16.mxu0 %v1773_v4  ;;  %v1145_v4 = vld [vmem:[%s2052_s3 + $0x20] sm:$0xff] }
  0x4f   :  { %1550 = vmatpush3.bf16.msra.mxu1 %v1772_v3  ;;  %v1683_v3 = vpack.c.bf16 %v1144_v2, %v1143_v63  ;;  %v1234_v2 = vlaneseq }
  0x50   :  { %1551 = vmatprep.subr.bf16.mxu1 %v1775_v6 }
  0x51   :  { %1530 = vmatpush3.bf16.msra.mxu0 %v1774_v5  ;;  %v1146_v5 = vld [vmem:[%s2052_s3 + $0x28] sm:$0xff] }
  0x52   :  { %1559 = vmatprep.subr.bf16.mxu0 %v1777_v12  ;;  %v1686_v6 = vpack.c.bf16 %v1146_v5, %v1145_v4  ;;  %v1468_v4 = vld [vmem:[%s2053_s4] ss:$0 sm:$0xff] }
  0x53   :  { %1552 = vmatpush3.bf16.msra.mxu1 %v1776_v7  ;;  %v1147_v7 = vld [vmem:[%s2052_s3 + $0x30] sm:$0xff] }
  0x54   :  { %973 = vmatmul.mubr.bf16.vlgmr.msra.gmra.mrb[4].mxu0 %v56_v11  ;;  %1581 = vmatprep.subr.bf16.mxu1 %v1779_v16  ;;  %v1689_v9 = vpack.c.bf16 %v1148_v8, %v1147_v7  ;;  %v1150_v11 = vld [vmem:[%s2052_s3 + $0x48] sm:$0xff]  ;;  %v1153_v16 = vld [vmem:[%s2052_s3 + $0x60] sm:$0xff] }
  0x55   :  { %1560 = vmatpush3.bf16.msra.mxu0 %v1778_v15  ;;  %1052 = vmatprep.mubr.bf16.mxu0 %v61_v49  ;;  %v1692_v12 = vpack.c.bf16 %v1150_v11, %v1149_v10  ;;  %v1695_v15 = vpack.c.bf16 %v1152_v14, %v1151_v13 }
  0x56   :  { %1013 = vmatmul.mubr.bf16.vlgmr.msra.gmra.mrb[4].mxu1 %v58_v18  ;;  %1561 = vmatprep.subr.bf16.mxu0 %v1781_v20  ;;  %v1698_v18 = vpack.c.bf16 %v1154_v17, %v1153_v16  ;;  %v1156_v20 = vld [vmem:[%s2052_s3 + $0x78] sm:$0xff] }
  0x57   :  { %1582 = vmatpush3.bf16.msra.mxu1 %v1780_v19  ;;  %1092 = vmatprep.mubr.bf16.mxu1 %v63_v55  ;;  %v1155_v19 = vld [vmem:[%s2052_s3 + $0x70] sm:$0xff] }
  0x58   :  { %1583 = vmatprep.subr.bf16.mxu1 %v1783_v22 }
  0x59   :  { %1562 = vmatpush3.bf16.msra.mxu0 %v1782_v21  ;;  %v1701_v21 = vpack.c.bf16 %v1156_v20, %v1155_v19 }
  0x5a   :  { %1563 = vmatprep.subr.bf16.mxu0 %v1785_v24 }
  0x5b   :  { %1584 = vmatpush3.bf16.msra.mxu1 %v1784_v23  ;;  %v1368_v23 = vld [vmem:[%s2051_s2] ss:$0 sm:$0xff] }
  0x5c   :  { %1585 = vmatprep.subr.bf16.mxu1 %v1787_v26 }
  0x5d   :  { %1564 = vmatpush3.bf16.msra.mxu0 %v1786_v25 }
  0x5e   :  { %1565 = vmatprep.subr.bf16.mxu0 %v1789_v28 }
  0x5f   :  { %1586 = vmatpush3.bf16.msra.mxu1 %v1788_v27 }
  0x60   :  { %1587 = vmatprep.subr.bf16.mxu1 %v1791_v30 }
  0x61   :  { %1566 = vmatpush3.bf16.msra.mxu0 %v1790_v29 }
  0x62   :  { %1567 = vmatprep.subr.bf16.mxu0 %v1793_v32 }
  0x63   :  { %1588 = vmatpush3.bf16.msra.mxu1 %v1792_v31 }
  0x64   :  { %1589 = vmatprep.subr.bf16.mxu1 %v1795_v34 }
  0x65   :  { %1568 = vmatpush3.bf16.msra.mxu0 %v1794_v33 }
  0x66   :  { %1569 = vmatprep.subr.bf16.mxu0 %v1797_v36 }
  0x67   :  { %1590 = vmatpush3.bf16.msra.mxu1 %v1796_v35 }
  0x68   :  { %1591 = vmatprep.subr.bf16.mxu1 %v1799_v38 }
  0x69   :  { %1570 = vmatpush3.bf16.msra.mxu0 %v1798_v37 }
  0x6a   :  { %1571 = vmatprep.subr.bf16.mxu0 %v1801_v40 }
  0x6b   :  { %1592 = vmatpush3.bf16.msra.mxu1 %v1800_v39 }
  0x6c   :  { %1593 = vmatprep.subr.bf16.mxu1 %v1803_v42 }
  0x6d   :  { %1572 = vmatpush3.bf16.msra.mxu0 %v1802_v41 }
  0x6e   :  { %1573 = vmatprep.subr.bf16.mxu0 %v1805_v44 }
  0x6f   :  { %1594 = vmatpush3.bf16.msra.mxu1 %v1804_v43 }
  0x70   :  { %1595 = vmatprep.subr.bf16.mxu1 %v1807_v46 }
  0x71   :  { %1574 = vmatpush3.bf16.msra.mxu0 %v1806_v45 }
  0x72   :  { %1627 = vmatprep.subr.bf16.mxu0 %v1866_v52 }
  0x73   :  { %1596 = vmatpush3.bf16.msra.mxu1 %v1808_v47 }
  0x74   :  { %1053 = vmatmul.mubr.bf16.vlgmr.msra.gmra.mrb[8].mxu0 %v60_v54  ;;  %1679 = vmatprep.subr.bf16.mxu1 %v1868_v0 }
  0x75   :  { %1628 = vmatpush3.bf16.msra.mxu0 %v1809_v57  ;;  %1631 = vmatprep.mubr.msk.bf16.mxu0 %vm1867_vm0, %v1866_v52 }
  0x76   :  { %1093 = vmatmul.mubr.bf16.vlgmr.msra.gmra.mrb[8].mxu1 %v62_v56  ;;  %1629 = vmatprep.subr.bf16.mxu0 %v1866_v52 }
  0x77   :  { %1667 = vmatprep.mubr.msk.f32.mxu1 %vm1867_vm0, %v1866_v52  ;;  %1681 = vmatpush3.bf16.msra.mxu1 %v1680_v1 }
  0x78   :  { %1682 = vmatprep.subr.bf16.mxu1 %v1868_v0 }
  0x79   :  { %1630 = vmatpush3.bf16.msra.mxu0 %v1810_v58 }
  0x7a   :  { %1703 = vmatprep.subr.bf16.mxu0 %v1868_v0 }
  0x7b   :  { %1684 = vmatpush3.bf16.msra.mxu1 %v1683_v3  ;;  %v1235_v3 = vand.u32 127, %v1234_v2 }
  0x7c   :  { %1632 = vmatmul.mubr.msk.bf16.vlgmr.msra.gmra.mrb[12].mxu0 %vm856_vm1, %v64_v60  ;;  %1685 = vmatprep.subr.bf16.mxu1 %v1868_v0 }
  0x7d   :  { %1676 = vmatprep.mubr.msk.f32.mxu0 %vm1867_vm0, %v1866_v52  ;;  %vm1236_vm2 = vcmp.lt.s32.totalorder %v1235_v3, 10 }
  0x7f   :  { %1687 = vmatpush3.bf16.msra.mxu1 %v1686_v6 }
  0x80   :  { %1688 = vmatprep.subr.bf16.mxu1 %v1868_v0 }
  0x83   :  { %1690 = vmatpush3.bf16.msra.mxu1 %v1689_v9 }
  0x84   :  { %1691 = vmatprep.subr.bf16.mxu1 %v1868_v0 }
  0x87   :  { %1693 = vmatpush3.bf16.msra.mxu1 %v1692_v12 }
  0x88   :  { %1694 = vmatprep.subr.bf16.mxu1 %v1868_v0 }
  0x8b   :  { %1696 = vmatpush3.bf16.msra.mxu1 %v1695_v15 }
  0x8c   :  { %1697 = vmatprep.subr.bf16.mxu1 %v1868_v0 }
  0x8f   :  { %1699 = vmatpush3.bf16.msra.mxu1 %v1698_v18 }
  0x90   :  { %1700 = vmatprep.subr.bf16.mxu1 %v1868_v0 }
  0x93   :  { %1702 = vmatpush3.bf16.msra.mxu1 %v1701_v21 }
 0x107   :  { %v1487_v22 = vpop.f32.mrb[0].mxu0 }
 0x108   :  { %v1488_v24 = vpop.f32.mrb[1].mxu0 }
 0x109   :  { %v1489_v25 = vadd.f32 %v1488_v24, %v1487_v22  ;;  %v1490_v26 = vpop.f32.mrb[2].mxu0  ;;  %v1509_v27 = vpop.f32.mrb[0].mxu1  ;;  %v1261_v22 = vld [vmem:[%s2054_s5] sm:$0xff] }
 0x10a   :  { %v1491_v28 = vpop.f32.mrb[3].mxu0  ;;  %v1510_v30 = vpop.f32.mrb[1].mxu1 }
 0x10b   :  { %v895_v29 = vadd.f32 %v1489_v25, %v1368_v23  ;;  %v1511_v31 = vadd.f32 %v1510_v30, %v1509_v27  ;;  %v1512_v32 = vpop.f32.mrb[2].mxu1  ;;  %v1262_v23 = vld [vmem:[%s2054_s5 + $0x8] sm:$0xff]  ;;  %v1263_v25 = vld [vmem:[%s2054_s5 + $0x10] sm:$0xf]  ;;  %s1869_s5 = smov [#allocation5]  }
 0x10c   :  { %v1513_v33 = vpop.f32.mrb[3].mxu1  ;;  %v1704_v24 = vpack.c.bf16 %v1262_v23, %v1261_v22  ;;  %s1359_s23 = sshll.u32 %s1869_s5, 4  ;;  %s1360_s23 = int_to_ptr.vmem [resolvable:$true] %s1359_s23 }
 0x10d   :  { %v935_v34 = vadd.f32 %v1511_v31, %v895_v29  ;;  %s1837_s24 = scalar_lea.vmem %s1360_s23, 16  ;;  %s1841_s25 = scalar_lea.vmem %s1360_s23, 32 }
 0x10e   :  { %1705 = vmatpush3.bf16.msra.mxu0 %v1704_v24  ;;  %p1838_p8 = scmp.ne.s32.totalorder %s1360_s23, %s1837_s24  ;;  %p1842_p9 = scmp.lt.s32.totalorder %s1360_s23, %s1360_s23 }
 0x10f   :  { %1674 = vmatprep.subr.mxu0 %v1866_v52  ;;  %p1843_p10 = scmp.lt.s32.totalorder %s1841_s25, %s1837_s24 }
 0x111   :  { %p1844_p11 = por %p1843_p10, %p1842_p9 }
 0x112   :  { %1675 = vmatpush3.msk.msra.mxu0 %vm1267_vm4, %v1263_v25 }
 0x113   :  { %p1845_p12 = pnand %p1844_p11, %p1838_p8 }
 0x127   :  { %v1531_v35 = vpop.f32.mrb[4].mxu0 }
 0x128   :  { %v1532_v36 = vpop.f32.mrb[5].mxu0 }
 0x129   :  { %v1533_v37 = vadd.f32 %v1532_v36, %v1531_v35  ;;  %v1534_v38 = vpop.f32.mrb[6].mxu0  ;;  %v1553_v39 = vpop.f32.mrb[4].mxu1 }
 0x12a   :  { %v1535_v40 = vpop.f32.mrb[7].mxu0  ;;  %v1554_v42 = vpop.f32.mrb[5].mxu1 }
 0x12b   :  { %v975_v41 = vadd.f32 %v1533_v37, %v935_v34  ;;  %v1555_v43 = vadd.f32 %v1554_v42, %v1553_v39  ;;  %v1556_v44 = vpop.f32.mrb[6].mxu1  ;;  %v1347_v34 = vshrl.u32 %v1234_v2, 7 }
 0x12c   :  { %v1557_v45 = vpop.f32.mrb[7].mxu1 }
 0x12d   :  { %v1015_v46 = vadd.f32 %v1555_v43, %v975_v41  ;;  %v1348_v35 = vsub.s32 %v1235_v3, %v1347_v34 }
 0x147   :  { %v1575_v47 = vpop.f32.mrb[8].mxu0 }
 0x148   :  { %v1576_v48 = vpop.f32.mrb[9].mxu0 }
 0x149   :  { %v1577_v49 = vadd.f32 %v1576_v48, %v1575_v47  ;;  %v1597_v50 = vpop.f32.mrb[8].mxu1  ;;  %v1578_v51 = vpop.f32.mrb[10].mxu0 }
 0x14a   :  { %v1598_v53 = vpop.f32.mrb[9].mxu1  ;;  %v1579_v54 = vpop.f32.mrb[11].mxu0 }
 0x14b   :  { %v1055_v55 = vadd.f32 %v1577_v49, %v1015_v46  ;;  %v1599_v56 = vadd.f32 %v1598_v53, %v1597_v50  ;;  %v1600_v57 = vpop.f32.mrb[10].mxu1 }
 0x14c   :  { %v1601_v58 = vpop.f32.mrb[11].mxu1 }
 0x14d   :  { %v1095_v59 = vadd.f32 %v1599_v56, %v1055_v55 }
 0x14f   :  { %v1134_v60 = vpop.f32.mrb[12].mxu0 }
 0x150   :  { %v1135_v61 = vadd.f32 %v1134_v60, %v1095_v59  ;;  %v1633_v62 = vpop.f32.mrb[13].mxu0 }
 0x151   :  { %v1137_v63 = vpop.f32.mrb[14].mxu0 }
 0x152   :  { %v1140_v0 = vmax.f32 %v1135_v61, 0.0  ;;  %v1634_v1 = vpop.f32.mrb[15].mxu0 }
 0x154   :  { %1668 = vmatmul.mubr.f32.vlgmr.msra.gmra.mrb[12].mxu1 %v1140_v0 }
 0x227   :  { %v1230_v5 = vpop.f32.mrb[12].mxu1 }
 0x228   :  { %v1231_v6 = vadd.f32 %v1468_v4, %v1230_v5  ;;  %v1669_v7 = vpop.f32.mrb[13].mxu1 }
 0x22a   :  { %v1237_v8 = vsel %vm1236_vm2, %v1231_v6, -inf  ;;  %v1242_v10 = vsel %vm1236_vm2, -inf, %v1231_v6 }
 0x22b   :  { %v1239_v9 = vsel %vm1238_vm3, %v1237_v8, -inf  ;;  %v1243_v11 = vsel %vm1238_vm3, %v1242_v10, -inf }
 0x22c   :  { %1240 = vmax.xlane.f32.xlu0 %v1239_v9 }
 0x230   :  { %1244 = vmax.xlane.f32.xlu0 %v1243_v11 }
 0x2b9   :  { %v1241_v12 = vpop.xlane.xlu0 %1240 }
 0x2bd   :  { %v1245_v13 = vpop.xlane.xlu0 %1244 }
 0x2be   :  { %v1246_v14 = vsel %vm1236_vm2, %v1241_v12, %v1245_v13 }
 0x2bf   :  { %v1247_v15 = vsub.f32 %v1231_v6, %v1246_v14 }
 0x2c1   :  { %v1248_v16 = vmul.f32 1.442695, %v1247_v15 }
 0x2c3   :  { %1811 = vpow2.f32 %v1248_v16 }
 0x2cd   :  { %v1812_v17 = vpop.eup %1811 }
 0x2ce   :  { %v1250_v18 = vsel %vm1236_vm2, %v1812_v17, 0.0  ;;  %v1254_v20 = vsel %vm1236_vm2, 0.0, %v1812_v17 }
 0x2cf   :  { %v1251_v19 = vsel %vm1238_vm3, %v1250_v18, 0.0  ;;  %v1255_v21 = vsel %vm1238_vm3, %v1254_v20, 0.0 }
 0x2d0   :  { %1252 = vadd.xlane.f32.xlu1 %v1251_v19 }
 0x2d4   :  { %1256 = vadd.xlane.f32.xlu1 %v1255_v21 }
 0x35d   :  { %v1253_v26 = vpop.xlane.xlu1 %1252 }
 0x361   :  { %v1257_v27 = vpop.xlane.xlu1 %1256 }
 0x362   :  { %v1258_v28 = vsel %vm1236_vm2, %v1253_v26, %v1257_v27 }
 0x363   :  { %1813 = vrcp.f32 %v1258_v28 }
 0x36d   :  { %v1814_v29 = vpop.eup %1813 }
 0x36e   :  { %v1260_v30 = vmul.f32 %v1814_v29, %v1812_v17 }
 0x370   :  { %1677 = vmatmul.mubr.msk.f32.vlgmr.msra.gmra.mrb[16].mxu0 %vm1238_vm3, %v1260_v30 }
 0x443   :  { %v1337_v31 = vpop.f32.mrb[16].mxu0 }
 0x444   :  { %v1341_v32 = vmul.f32 %v1337_v31, %v1260_v30  ;;  %v1678_v33 = vpop.f32.mrb[17].mxu0 }
 0x446   :  { %v1342_v52 = vsel %vm1238_vm3, %v1341_v32, 0.0 }
 0x447   :  { %1343 = vadd.xlane.f32.xlu0 %v1342_v52 }
 0x4d4   :  { %v1344_v36 = vpop.xlane.xlu0 %1343 }
 0x4d5   :  { %v1349_v37 = vrot.slane %v1344_v36, %v1348_v35 }
 0x4d7   :  { %1352 = vst.msk [vmem:[#allocation5] sm:$0x1] %vm1351_vm5, %v1349_v37 }
 0x4d8   :  { %1848 = shalt.err (!%p1845_p12)
}
 0x4d9   :  { %s1849_s28 = scalar_lea.hbm %s2055_s6, 16 }
 0x4da   :  { %p1850_p13 = scmp.ne.s32.totalorder %s2055_s6, %s1849_s28  ;;  %p1853_p0 = scmp.lt.u32.totalorder %s1849_s28, %s2055_s6 }
 0x4dc   :  { %p1855_p1 = pnand %p1853_p0, %p1850_p13 }
 0x4de   :  { %1858 = shalt.err (!%p1855_p1)
}
 0x4df   :  { %1362 = dma.vmem_to_hbm [thread:$0]  %s1360_s23, 16, %s2055_s6, [#allocation4]  }
 0x4e0   :  { %1861 = dma.done.wait [#allocation4], 16  }
 0x4e1   :  { %1862 = vsyncadd [#allocation4], 4294967280 }
 0x4e2   :  { %1366 = vsyncpa [#allocation3], 1 }
 0x4e3   :  { %1367 = vsyncpa [#allocation4], 1 }

</bundles_post_ra>
